<compile_context>
chip_gen: v5e
topology: v5e:2x2
jax: 0.10.0
libtpu: 0.0.40
codegen_flags: <defaults>
</compile_context>

<pallas_src>
import jax
import jax.numpy as jnp
from jax.experimental import pallas as pl
from jax.experimental.pallas import tpu as pltpu

_G = 8          # block-diagonal packing factor -> 256-wide K and N on the MXU
_C_OUT = 32     # stem conv output channels
_KP = 32        # stem conv K (= 3*3*3 = 27) padded to 32


def _cdiv(a, b):
    return (a + b - 1) // b


def _round_up(x, m):
    return _cdiv(x, m) * m


def _im2col_3x3_s2(x):
    """x: (N, H, W, C) NHWC -> (N, Ho*Wo, 9*C) patches for conv(k=3, s=2, p=1)."""
    N, H, W, C = x.shape
    Ho = (H - 1) // 2 + 1                   # matches PyTorch conv(k=3, s=2, p=1)
    Wo = (W - 1) // 2 + 1
    xp = jnp.pad(x, ((0, 0), (1, 1), (1, 1), (0, 0)))
    cols = []
    for dy in range(3):
        for dx in range(3):
            cols.append(xp[:, dy:dy + 2 * Ho:2, dx:dx + 2 * Wo:2, :])
    patches = jnp.stack(cols, axis=3)       # (N, Ho, Wo, 9, C)
    return patches.reshape(N, Ho * Wo, 9 * C), Ho * Wo


# --------------------- One fused kernel: stem conv + GAP + trunk + head ---------------------

def _fused_frame_kernel(x_ref, w_ref, b_ref, tw_ref, tb_ref, cw_ref, o_ref):
    """One frame per grid step (whole-frame spatial tile, write-once output).

    x_ref : (1, M, 256)  bf16  packed im2col patches (g=8 original rows per packed row)
    w_ref : (256, 256)   bf16  block-diagonal stem weight (BN folded, K padded 27->32)
    b_ref : (1, 256)     f32   stem bias tiled g times
    tw_ref: (256, 440)   bf16  trunk stand-in weight; g-group fold and 1/P folded in
    tb_ref: (1, 440)     f32   trunk bias; zero-padded-row correction folded in
    cw_ref: (1, 440, 4)  bf16  collapsed per-frame head  fc_w @ cls_w[4f:4f+4]
    o_ref : (1, 1, 4)    f32   per-frame logit contribution
    """
    # Stem conv (packed matmul) + bias + ReLU; f32 accumulation on the MXU.
    y = jnp.dot(x_ref[0], w_ref[...], preferred_element_type=jnp.float32)   # (M, 256)
    y = jnp.maximum(y + b_ref[...], 0.0)

    # Global average pool: raw row-sum kept in vregs; /P, the g-group fold and the
    # padded-row correction are folded into tw_ref / tb_ref.
    r = jnp.sum(y, axis=0, keepdims=True)                                    # (1, 256)

    # Trunk stand-in 32->440 + ReLU.  TODO(synk): real regnet_y_400mf trunk.
    feat = jnp.dot(r.astype(jnp.bfloat16), tw_ref[...],
                   preferred_element_type=jnp.float32) + tb_ref[...]
    feat = jnp.maximum(feat, 0.0)                                            # (1, 440)

    # Collapsed head: fc(440->4) -> concat -> dropout(p=0.65, eval)=identity -> cls(12->4).
    o_ref[0] = jnp.dot(feat.astype(jnp.bfloat16), cw_ref[0],
                       preferred_element_type=jnp.float32)                   # (1, 4)


# --------------------------------------- Forward --------------------------------------------

def wastes_classifier_forward(img, params):
    """img: (B, 3 frames, 3 ch, H, W) f32 -> logits (B, 4).  Inference / eval mode."""
    B, F_, C, H, W = img.shape
    Nf = B * F_
    f32 = jnp.float32

    # The three frames share CustomRegnet weights -> batch them together.
    frames = jnp.transpose(img.reshape(Nf, C, H, W), (0, 2, 3, 1)).astype(jnp.bfloat16)
    patches, P = _im2col_3x3_s2(frames)                           # (Nf, P, 27) bf16
    K = patches.shape[-1]

    # Pad P so the packed row count M = p_pad/g is a multiple of 16 (bf16 sublanes);
    # the extra zero rows are corrected exactly via the trunk bias fold below.
    p_pad = _round_up(P, _G * 16)
    n_pad = p_pad - P
    M = p_pad // _G
    patches = jnp.pad(patches, ((0, 0), (0, n_pad), (0, _KP - K)))
    patches = patches.reshape(Nf, M, _G * _KP)                    # free contiguous reshape

    # ---------------- weight prep (tiny, XLA-side) ----------------
    stem_b = params["stem_b"].astype(f32)
    w32 = jnp.pad(params["stem_w"].astype(f32), ((0, _KP - K), (0, 0)))      # (32, 32)
    w_block = jnp.kron(jnp.eye(_G, dtype=f32), w32).astype(jnp.bfloat16)     # (256, 256)
    b_tiled = jnp.tile(stem_b, (_G,)).reshape(1, _G * _C_OUT)                # (1, 256) f32

    trunk_w = params["trunk_w"].astype(f32)                                  # (32, 440)
    trunk_b = params["trunk_b"].astype(f32)                                  # (440,)
    # gap = (fold_g(rawsum) - n_pad * relu(stem_b)) / P   folded into trunk weight/bias.
    tw_eff = jnp.tile(trunk_w / P, (_G, 1)).astype(jnp.bfloat16)             # (256, 440)
    tb_eff = (trunk_b
              - (n_pad / P) * (jnp.maximum(stem_b, 0.0) @ trunk_w)).reshape(1, 440)

    # Collapse fc / concat / dropout(eval) / classifier:
    #   logits = comb_b + sum_f relu(trunk(gap_f)) @ comb_w[f]
    cls_w3 = params["cls_w"].astype(f32).reshape(F_, 4, 4)                   # rows 4f:4f+4
    comb_w = jnp.einsum("kn,fnm->fkm", params["fc_w"].astype(f32), cls_w3)   # (3, 440, 4)
    comb_b = params["cls_b"].astype(f32) + jnp.einsum(
        "n,fnm->m", params["fc_b"].astype(f32), cls_w3)                      # (4,)
    comb_w = comb_w.astype(jnp.bfloat16)

    per_frame = pl.pallas_call(
        _fused_frame_kernel,
        out_shape=jax.ShapeDtypeStruct((Nf, 1, 4), jnp.float32),
        grid=(Nf,),
        in_specs=[
            pl.BlockSpec((1, M, _G * _KP), lambda nf: (nf, 0, 0)),
            pl.BlockSpec((_G * _KP, _G * _KP), lambda nf: (0, 0)),
            pl.BlockSpec((1, _G * _C_OUT), lambda nf: (0, 0)),
            pl.BlockSpec((_G * _C_OUT, 440), lambda nf: (0, 0)),
            pl.BlockSpec((1, 440), lambda nf: (0, 0)),
            pl.BlockSpec((1, 440, 4), lambda nf: (nf % F_, 0, 0)),
        ],
        out_specs=pl.BlockSpec((1, 1, 4), lambda nf: (nf, 0, 0)),
        compiler_params=pltpu.CompilerParams(
            dimension_semantics=("parallel",)),
    )(patches, w_block, b_tiled, tw_eff, tb_eff, comb_w)

    # Only remaining XLA-side work: cross-frame sum + combined bias.
    return per_frame.reshape(B, F_, 4).sum(axis=1) + comb_b


# ------------------------------- Pure-JAX f32 reference -------------------------------------

def _reference_forward(img, params):
    B, F_, C, H, W = img.shape
    frames = jnp.transpose(img.reshape(B * F_, C, H, W), (0, 2, 3, 1)).astype(jnp.float32)
    patches, _ = _im2col_3x3_s2(frames)                           # (Nf, P, 27) f32
    y = jnp.maximum(jnp.einsum("npk,kc->npc", patches, params["stem_w"])
                    + params["stem_b"], 0.0)
    gap = jnp.mean(y, axis=1)                                     # (Nf, 32)
    feat = jnp.maximum(gap @ params["trunk_w"] + params["trunk_b"], 0.0)
    per = feat @ params["fc_w"] + params["fc_b"]                  # (Nf, 4)
    cat = per.reshape(B, F_ * 4)                                  # == torch.cat(dim=1)
    # dropout(p=0.65, training=False) == identity
    return cat @ params["cls_w"] + params["cls_b"]


# ------------------------------------ Parameters --------------------------------------------

def init_params(key):
    ks = jax.random.split(key, 8)
    return {
        # stem conv weight laid out (dy, dx, c_in) x c_out -> (27, 32); BN folded in.
        "stem_w": 0.10 * jax.random.normal(ks[0], (27, 32), jnp.float32),
        "stem_b": 0.05 * jax.random.normal(ks[1], (32,), jnp.float32),
        # trunk stand-in projection 32 -> 440 (see TODO above).
        "trunk_w": 0.10 * jax.random.normal(ks[2], (32, 440), jnp.float32),
        "trunk_b": 0.05 * jax.random.normal(ks[3], (440,), jnp.float32),
        # res.fc : Linear(440, 4)
        "fc_w": 0.05 * jax.random.normal(ks[4], (440, 4), jnp.float32),
        "fc_b": 0.05 * jax.random.normal(ks[5], (4,), jnp.float32),
        # classifier : Linear(12, 4)
        "cls_w": 0.20 * jax.random.normal(ks[6], (12, 4), jnp.float32),
        "cls_b": 0.05 * jax.random.normal(ks[7], (4,), jnp.float32),
    }


# ---------------------------------------- Main -----------------------------------------------

if __name__ == "__main__":
    key = jax.random.PRNGKey(0)
    k_img, k_par = jax.random.split(key)

    B, F_, C, H, W = 2, 3, 3, 16, 16          # small stand-in for (B, 3, 3, 224, 224)
    img = jax.random.normal(k_img, (B, F_, C, H, W), jnp.float32)
    params = init_params(k_par)

    logits = jax.jit(wastes_classifier_forward)(img, params)
    logits = jax.block_until_ready(logits)

    assert logits.shape == (B, 4), logits.shape
    assert logits.dtype == jnp.float32

    # 16x16 -> P=64 < p_pad=128, so the padded-row correction path is exercised here.
    ref = _reference_forward(img, params)
    assert jnp.allclose(logits, ref, atol=5e-2, rtol=1e-1), (
        "max abs err vs f32 reference: %s" % float(jnp.max(jnp.abs(logits - ref))))

    print("KERNEL_OK")
</pallas_src>

<mosaic_0001>
module attributes {stable_mosaic.version = 11 : i64} {
  func.func @_fused_frame_kernel(%arg0: i32, %arg1: memref<1x16x256xbf16, #tpu.memory_space<vmem>>, %arg2: memref<256x256xbf16, #tpu.memory_space<vmem>>, %arg3: memref<1x256xf32, #tpu.memory_space<vmem>>, %arg4: memref<256x440xbf16, #tpu.memory_space<vmem>>, %arg5: memref<1x440xf32, #tpu.memory_space<vmem>>, %arg6: memref<1x440x4xbf16, #tpu.memory_space<vmem>>, %arg7: memref<1x1x4xf32, #tpu.memory_space<vmem>>) attributes {dimension_semantics = [#tpu.dimension_semantics<parallel>], iteration_bounds = array<i64: 6>, scalar_prefetch = 0 : i64, scratch_operands = 0 : i64, tpu.core_type = #tpu.core_type<tc>, window_params = [{transform_indices = @transform_0, window_bounds = array<i64: 1, 16, 256>}, {pipeline_mode = #tpu.pipeline_mode<synchronous>, transform_indices = @transform_1, window_bounds = array<i64: 256, 256>}, {pipeline_mode = #tpu.pipeline_mode<synchronous>, transform_indices = @transform_2, window_bounds = array<i64: 1, 256>}, {pipeline_mode = #tpu.pipeline_mode<synchronous>, transform_indices = @transform_3, window_bounds = array<i64: 256, 440>}, {pipeline_mode = #tpu.pipeline_mode<synchronous>, transform_indices = @transform_4, window_bounds = array<i64: 1, 440>}, {transform_indices = @transform_5, window_bounds = array<i64: 1, 440, 4>}, {transform_indices = @transform_6, window_bounds = array<i64: 1, 1, 4>}]} {
    %c0 = arith.constant 0 : index
    %c0_0 = arith.constant 0 : index
    %c0_1 = arith.constant 0 : index
    %0 = vector.load %arg1[%c0, %c0_0, %c0_1] : memref<1x16x256xbf16, #tpu.memory_space<vmem>>, vector<1x16x256xbf16>
    %1 = vector.shape_cast %0 : vector<1x16x256xbf16> to vector<16x256xbf16>
    %c0_2 = arith.constant 0 : index
    %c0_3 = arith.constant 0 : index
    %2 = vector.load %arg2[%c0_2, %c0_3] : memref<256x256xbf16, #tpu.memory_space<vmem>>, vector<256x256xbf16>
    %cst = arith.constant dense<0.000000e+00> : vector<16x256xf32>
    %3 = tpu.matmul %1, %2, %cst {dimension_numbers = #tpu.dot_dimension_numbers<[1], [0], [0], [1], [0, 0, 1, 1], [], []>} : vector<16x256xbf16>, vector<256x256xbf16>, vector<16x256xf32> -> vector<16x256xf32>
    %c0_4 = arith.constant 0 : index
    %c0_5 = arith.constant 0 : index
    %4 = vector.load %arg3[%c0_4, %c0_5] : memref<1x256xf32, #tpu.memory_space<vmem>>, vector<1x256xf32>
    %5 = vector.broadcast %4 : vector<1x256xf32> to vector<16x256xf32>
    %6 = arith.addf %3, %5 : vector<16x256xf32>
    %cst_6 = arith.constant 0.000000e+00 : f32
    %7 = vector.broadcast %cst_6 : f32 to vector<16x256xf32>
    %8 = arith.maximumf %6, %7 : vector<16x256xf32>
    %cst_7 = arith.constant dense<0.000000e+00> : vector<256xf32>
    %9 = vector.multi_reduction <add>, %8, %cst_7 [0] : vector<16x256xf32> to vector<256xf32>
    %10 = vector.shape_cast %9 : vector<256xf32> to vector<1x256xf32>
    %11 = arith.truncf %10 : vector<1x256xf32> to vector<1x256xbf16>
    %c0_8 = arith.constant 0 : index
    %c0_9 = arith.constant 0 : index
    %12 = vector.load %arg4[%c0_8, %c0_9] : memref<256x440xbf16, #tpu.memory_space<vmem>>, vector<256x440xbf16>
    %cst_10 = arith.constant dense<0.000000e+00> : vector<1x440xf32>
    %13 = tpu.matmul %11, %12, %cst_10 {dimension_numbers = #tpu.dot_dimension_numbers<[1], [0], [0], [1], [0, 0, 1, 1], [], []>} : vector<1x256xbf16>, vector<256x440xbf16>, vector<1x440xf32> -> vector<1x440xf32>
    %c0_11 = arith.constant 0 : index
    %c0_12 = arith.constant 0 : index
    %14 = vector.load %arg5[%c0_11, %c0_12] : memref<1x440xf32, #tpu.memory_space<vmem>>, vector<1x440xf32>
    %15 = arith.addf %13, %14 : vector<1x440xf32>
    %cst_13 = arith.constant 0.000000e+00 : f32
    %16 = vector.broadcast %cst_13 : f32 to vector<1x440xf32>
    %17 = arith.maximumf %15, %16 : vector<1x440xf32>
    %18 = arith.truncf %17 : vector<1x440xf32> to vector<1x440xbf16>
    %c0_14 = arith.constant 0 : index
    %c0_15 = arith.constant 0 : index
    %c0_16 = arith.constant 0 : index
    %19 = vector.load %arg6[%c0_14, %c0_15, %c0_16] : memref<1x440x4xbf16, #tpu.memory_space<vmem>>, vector<1x440x4xbf16>
    %20 = vector.shape_cast %19 : vector<1x440x4xbf16> to vector<440x4xbf16>
    %cst_17 = arith.constant dense<0.000000e+00> : vector<1x4xf32>
    %21 = tpu.matmul %18, %20, %cst_17 {dimension_numbers = #tpu.dot_dimension_numbers<[1], [0], [0], [1], [0, 0, 1, 1], [], []>} : vector<1x440xbf16>, vector<440x4xbf16>, vector<1x4xf32> -> vector<1x4xf32>
    %c0_18 = arith.constant 0 : index
    %c0_19 = arith.constant 0 : index
    %c0_20 = arith.constant 0 : index
    %22 = vector.load %arg7[%c0_18, %c0_19, %c0_20] : memref<1x1x4xf32, #tpu.memory_space<vmem>>, vector<1x1x4xf32>
    %23 = vector.shape_cast %22 : vector<1x1x4xf32> to vector<1x4xf32>
    %24 = vector.shape_cast %21 : vector<1x4xf32> to vector<1x1x4xf32>
    tpu.vector_store %arg7[%c0_18, %c0_19, %c0_20], %24 {strides = array<i32>} : memref<1x1x4xf32, #tpu.memory_space<vmem>>, vector<1x1x4xf32>,
    return
  }
  func.func @transform_0(%arg0: i32) -> (i32, i32, i32) {
    %c0_i32 = arith.constant 0 : i32
    %c0_i32_0 = arith.constant 0 : i32
    %c0_i32_1 = arith.constant 0 : i32
    return %arg0, %c0_i32, %c0_i32_0 : i32, i32, i32
  }
  func.func @transform_1(%arg0: i32) -> (i32, i32) {
    %c0_i32 = arith.constant 0 : i32
    %c0_i32_0 = arith.constant 0 : i32
    %c0_i32_1 = arith.constant 0 : i32
    return %c0_i32, %c0_i32_0 : i32, i32
  }
  func.func @transform_2(%arg0: i32) -> (i32, i32) {
    %c0_i32 = arith.constant 0 : i32
    %c0_i32_0 = arith.constant 0 : i32
    %c0_i32_1 = arith.constant 0 : i32
    return %c0_i32, %c0_i32_0 : i32, i32
  }
  func.func @transform_3(%arg0: i32) -> (i32, i32) {
    %c0_i32 = arith.constant 0 : i32
    %c0_i32_0 = arith.constant 0 : i32
    %c0_i32_1 = arith.constant 0 : i32
    return %c0_i32, %c0_i32_0 : i32, i32
  }
  func.func @transform_4(%arg0: i32) -> (i32, i32) {
    %c0_i32 = arith.constant 0 : i32
    %c0_i32_0 = arith.constant 0 : i32
    %c0_i32_1 = arith.constant 0 : i32
    return %c0_i32, %c0_i32_0 : i32, i32
  }
  func.func @transform_5(%arg0: i32) -> (i32, i32, i32) {
    %c3_i32 = arith.constant 3 : i32
    %c0_i32 = arith.constant 0 : i32
    %0 = arith.cmpi eq, %c3_i32, %c0_i32 : i32
    %c1_i32 = arith.constant 1 : i32
    %1 = arith.select %0, %c1_i32, %c3_i32 : i32
    %2 = arith.remsi %arg0, %1 : i32
    %c0_i32_0 = arith.constant 0 : i32
    %3 = arith.cmpi ne, %2, %c0_i32_0 : i32
    %c0_i32_1 = arith.constant 0 : i32
    %4 = arith.cmpi slt, %2, %c0_i32_1 : i32
    %c0_i32_2 = arith.constant 0 : i32
    %5 = arith.cmpi slt, %1, %c0_i32_2 : i32
    %6 = arith.xori %4, %5 : i1
    %7 = arith.andi %6, %3 : i1
    %8 = arith.addi %2, %1 : i32
    %9 = arith.select %7, %8, %2 : i32
    %c0_i32_3 = arith.constant 0 : i32
    %c0_i32_4 = arith.constant 0 : i32
    %c0_i32_5 = arith.constant 0 : i32
    return %9, %c0_i32_3, %c0_i32_4 : i32, i32, i32
  }
  func.func @transform_6(%arg0: i32) -> (i32, i32, i32) {
    %c0_i32 = arith.constant 0 : i32
    %c0_i32_0 = arith.constant 0 : i32
    %c0_i32_1 = arith.constant 0 : i32
    return %arg0, %c0_i32, %c0_i32_0 : i32, i32, i32
  }
}

</mosaic_0001>

<bundles_post_ra>
// kernel: tile.13
= control target key start
LH: loop header
LB: loop body
LE: loop exit
PB: predicated region body
PF: predicated region fallthrough
CT: control target
= control target key end

     0   :  { %s22_s0 = inlined_call_operand.vmem [shape: f32[32], index: 0, kind: input, shape index: {}]   ;;  %s23_s1 = inlined_call_operand.vmem [shape: f32[8,32], index: 1, kind: output, shape index: {}]  }
   0x1   :  { %v4_v0 = vld [vmem:[%s22_s0] ss:$0 sm:$0xff] }
   0x2   :  { %5 = vst [vmem:[%s23_s1] sm:$0xff] %v4_v0 }

// kernel: tile.14
= control target key start
LH: loop header
LB: loop body
LE: loop exit
PB: predicated region body
PF: predicated region fallthrough
CT: control target
= control target key end

     0   :  { %s7_s6 = smov 3  ;;  %s46_s9 = smov 96   ;;  %vm4_vm0 = vcmask 261120   ;;  %vm11_vm1 = vcmask 1048320   ;;  %vm18_vm2 = vcmask 785920   ;;  %vm25_vm3 = vcmask 523520   ;;  %s77_s0 = inlined_call_operand.vmem [shape: f32[8,32], index: 0, kind: input, shape index: {}]   ;;  %s78_s1 = inlined_call_operand.vmem [shape: f32[1,256], index: 1, kind: output, shape index: {}]  }
   0x1   :  { %v39_v0 = vld [vmem:[%s77_s0 + $0x3] ss:$4 sm:%s7_s6]   ;;  %s21_s10 = smov 3  ;;  %s14_s13 = smov 3 }
   0x2   :  { %9 = vrot.lane.b32.xlu0 %v39_v0, %s46_s9  ;;  %v41_v1 = vld [vmem:[%s77_s0 + $0x1] ss:$4 sm:%s21_s10]   ;;  %s47_s14 = smov 32   ;;  %s48_s17 = smov 64  }
   0x3   :  { %23 = vrot.lane.b32.xlu1 %v41_v1, %s47_s14  ;;  %v40_v2 = vld [vmem:[%s77_s0 + $0x2] ss:$4 sm:%s14_s13]   ;;  %s2_s18 = smov 3 }
   0x4   :  { %v3_v3 = vld [vmem:[%s77_s0] ss:$4 sm:%s2_s18]  }
   0x5   :  { %5 = vst.msk [vmem:[#allocation0] ss:$8 sm:$0x3] %vm4_vm0, %v3_v3  }
   0xa   :  { %16 = vrot.lane.b32.xlu0 %v40_v2, %s48_s17 }
  0x74   :  { %v10_v4 = vpop.permute.xlu0 %9  }
  0x75   :  { %12 = vst.msk [vmem:[#allocation0] ss:$8 sm:$0x3] %vm11_vm1, %v10_v4   ;;  %v24_v5 = vpop.permute.xlu1 %23  }
  0x7c   :  { %v17_v6 = vpop.permute.xlu0 %16  }
  0x7d   :  { %19 = vst.msk [vmem:[#allocation0] ss:$8 sm:$0x3] %vm18_vm2, %v17_v6  }
  0x7e   :  { %26 = vst.msk [vmem:[#allocation0] ss:$8 sm:$0x3] %vm25_vm3, %v24_v5  }
  0x85   :  { %v29_v7 = vld [vmem:[#allocation0] sm:$0x1]  ;;  %v34_v8 = vld [vmem:[#allocation0 + $0x8] sm:$0x1] }
  0x86   :  { %32 = vst [vmem:[%s78_s1] sm:$0x1] %v29_v7 }
  0x87   :  { %42 = vst [vmem:[%s78_s1 + $0x1] sm:$0x1] %v34_v8 }

// kernel: sub.1
= control target key start
LH: loop header
LB: loop body
LE: loop exit
PB: predicated region body
PF: predicated region fallthrough
CT: control target
= control target key end

     0   :  { %s34_s0 = inlined_call_operand.vmem [shape: f32[440], index: 0, kind: input, shape index: {}]   ;;  %s35_s1 = inlined_call_operand.vmem [shape: f32[440], index: 1, kind: input, shape index: {}]   ;;  %s36_s2 = inlined_call_operand.vmem [shape: f32[440], index: 2, kind: output, shape index: {}]  }
   0x1   :  { %v3_v0 = vld [vmem:[%s34_s0] sm:$0xf] }
   0x2   :  { %v4_v1 = vld [vmem:[%s35_s1] sm:$0xf] }
   0x3   :  { %v7_v2 = vsub.f32 %v3_v0, %v4_v1 }
   0x5   :  { %9 = vst [vmem:[%s36_s2] sm:$0xf] %v7_v2 }

// kernel: wastes_classifier_forward.1
= control target key start
LH: loop header
LB: loop body
LE: loop exit
PB: predicated region body
PF: predicated region fallthrough
CT: control target
= control target key end

     0   :  { %s2195_s21 = smov 0   ;;  %s2861_s0 = inlined_call_operand.vmem [shape: bf16[6,16,256], index: 0, kind: input, shape index: {}]   ;;  %s2862_s1 = inlined_call_operand.vmem [shape: bf16[256,256], index: 1, kind: input, shape index: {}]   ;;  %s2863_s2 = inlined_call_operand.vmem [shape: f32[1,256], index: 2, kind: input, shape index: {}]   ;;  %s2864_s3 = inlined_call_operand.vmem [shape: bf16[256,440], index: 3, kind: input, shape index: {}]   ;;  %s2865_s4 = inlined_call_operand.vmem [shape: f32[1,440], index: 4, kind: input, shape index: {}]   ;;  %s2866_s5 = inlined_call_operand.vmem [shape: bf16[3,440,4], index: 5, kind: input, shape index: {}]   ;;  %s2867_s6 = inlined_call_operand.vmem [shape: f32[6,1,4], index: 6, kind: output, shape index: {}]  }
   0x1 LB: > { %s2201_s22 = sadd.s32 4294967295, %s2158_s21   ;;  %p1503_p0 = scmp.ge.s32.totalorder %s2158_s21, 1  ;;  %s2158_s21 = sphi %s2195_s21, %s16_s21  }
   0x2   : > { %p274_p1 = scmp.lt.s32.totalorder %s2158_s21, 7 }
   0x4   : > { %p275_p2 = pnand %p1503_p0, %p274_p1 }
   0x5   : > { %p320_p3 = scmp.lt.s32.totalorder (!%p275_p2), %s2201_s22, 5  ;;  %s326_s30 = ssub.s32 (!%p275_p2), 0, %s2201_s22 }
   0x6   : > { %278 = sbr.rel (%p275_p2) target bundleno = 504 (0x1f8), region = 44  ;;  %s1506_s8 = smin.u32 (!%p275_p2), %s2201_s22, %s326_s30 }
   0x7   : > { %2149 = sdivrem.u32 (!%p275_p2), %s1506_s8, 3  ;;  %p325_p4 = scmp.lt.s32.totalorder (!%p275_p2), %s2201_s22, 0 }
   0xb   : > { %v1576_v0 = vld [vmem:[%s2862_s1 + $0x70] sm:$0xf]  ;;  %v2031_v1 = vld [vmem:[%s2862_s1 + $0x74] sm:$0xf0]  ;;  %v2030_v5 = vld [vmem:[%s2862_s1 + $0x74] sm:$0xf] }
   0xc   : > { %v1640_v2 = vld [vmem:[%s2862_s1 + $0xf0] sm:$0xf]  ;;  %v1577_v3 = vor.u32 %v2031_v1, %v1576_v0  ;;  %v2047_v4 = vld [vmem:[%s2862_s1 + $0xf4] sm:$0xf0]  ;;  %v1578_v6 = vld [vmem:[%s2862_s1 + $0x78] sm:$0xf0] }
   0xd   : > { %v1641_v7 = vor.u32 %v2047_v4, %v1640_v2  ;;  %v1581_v8 = vor.u32 %v2030_v5, %v1578_v6  ;;  %v2046_v9 = vld [vmem:[%s2862_s1 + $0xf4] sm:$0xf]  ;;  %v1642_v10 = vld [vmem:[%s2862_s1 + $0xf8] sm:$0xf0]  ;;  %v1568_v11 = vld [vmem:[%s2862_s1 + $0x60] sm:$0xf] }
   0xe   : > { %570 = vmatpush.bf16.msra.mxu0 %v1577_v3  ;;  %v1645_v12 = vor.u32 %v2046_v9, %v1642_v10  ;;  %v2029_v13 = vld [vmem:[%s2862_s1 + $0x64] sm:$0xf0]  ;;  %v1632_v14 = vld [vmem:[%s2862_s1 + $0xe0] sm:$0xf]  ;;  %v2028_v18 = vld [vmem:[%s2862_s1 + $0x64] sm:$0xf] }
   0xf   : > { %v2045_v15 = vld [vmem:[%s2862_s1 + $0xe4] sm:$0xf0]  ;;  %584 = vmatpush.bf16.msra.mxu1 %v1641_v7  ;;  %598 = vmatpush.bf16.msra.mxu2 %v1581_v8  ;;  %v1569_v16 = vor.u32 %v2029_v13, %v1568_v11  ;;  %v1570_v19 = vld [vmem:[%s2862_s1 + $0x68] sm:$0xf0]  ;;  %v2044_v20 = vld [vmem:[%s2862_s1 + $0xe4] sm:$0xf] }
  0x10   : > { %v1633_v17 = vor.u32 %v2045_v15, %v1632_v14  ;;  %612 = vmatpush.bf16.msra.mxu3 %v1645_v12  ;;  %v1573_v21 = vor.u32 %v2028_v18, %v1570_v19  ;;  %v1634_v22 = vld [vmem:[%s2862_s1 + $0xe8] sm:$0xf0]  ;;  %v1560_v23 = vld [vmem:[%s2862_s1 + $0x50] sm:$0xf]  ;;  %v2027_v24 = vld [vmem:[%s2862_s1 + $0x54] sm:$0xf0]  ;;  %s2150_s9 = spop.drf %2149 }
  0x11   : > { %v1637_v25 = vor.u32 %v2044_v20, %v1634_v22  ;;  %v1624_v26 = vld [vmem:[%s2862_s1 + $0xd0] sm:$0xf]  ;;  %v2043_v27 = vld [vmem:[%s2862_s1 + $0xd4] sm:$0xf0]  ;;  %v2026_v28 = vld [vmem:[%s2862_s1 + $0x54] sm:$0xf]  ;;  %v1561_v29 = vor.u32 %v2027_v24, %v1560_v23  ;;  %s2656_s25 = spop.drf %2149 }
  0x12   : > { %571 = vmatpush.bf16.msra.mxu0 %v1569_v16  ;;  %v1562_v30 = vld [vmem:[%s2862_s1 + $0x58] sm:$0xf0]  ;;  %v2042_v31 = vld [vmem:[%s2862_s1 + $0xd4] sm:$0xf]  ;;  %v1625_v33 = vor.u32 %v2043_v27, %v1624_v26  ;;  %v1552_v35 = vld [vmem:[%s2862_s1 + $0x40] sm:$0xf] }
  0x13   : > { %v1626_v32 = vld [vmem:[%s2862_s1 + $0xd8] sm:$0xf0]  ;;  %585 = vmatpush.bf16.msra.mxu1 %v1633_v17  ;;  %599 = vmatpush.bf16.msra.mxu2 %v1573_v21  ;;  %v1565_v34 = vor.u32 %v2026_v28, %v1562_v30  ;;  %v2025_v36 = vld [vmem:[%s2862_s1 + $0x44] sm:$0xf0]  ;;  %v1616_v37 = vld [vmem:[%s2862_s1 + $0xc0] sm:$0xf] }
  0x14   : > { %613 = vmatpush.bf16.msra.mxu3 %v1637_v25  ;;  %v1629_v38 = vor.u32 %v2042_v31, %v1626_v32  ;;  %v2041_v39 = vld [vmem:[%s2862_s1 + $0xc4] sm:$0xf0]  ;;  %v2024_v40 = vld [vmem:[%s2862_s1 + $0x44] sm:$0xf]  ;;  %v1554_v41 = vld [vmem:[%s2862_s1 + $0x48] sm:$0xf0]  ;;  %v1553_v44 = vor.u32 %v2025_v36, %v1552_v35 }
  0x15   : > { %v2040_v42 = vld [vmem:[%s2862_s1 + $0xc4] sm:$0xf]  ;;  %v1618_v43 = vld [vmem:[%s2862_s1 + $0xc8] sm:$0xf0]  ;;  %v1617_v45 = vor.u32 %v2041_v39, %v1616_v37  ;;  %v1557_v46 = vor.u32 %v2024_v40, %v1554_v41  ;;  %v1544_v47 = vld [vmem:[%s2862_s1 + $0x30] sm:$0xf] }
  0x16   : > { %572 = vmatpush.bf16.msra.mxu0 %v1561_v29  ;;  %v2023_v48 = vld [vmem:[%s2862_s1 + $0x34] sm:$0xf0]  ;;  %v1608_v49 = vld [vmem:[%s2862_s1 + $0xb0] sm:$0xf]  ;;  %v1621_v50 = vor.u32 %v2040_v42, %v1618_v43  ;;  %v2022_v52 = vld [vmem:[%s2862_s1 + $0x34] sm:$0xf] }
  0x17   : > { %586 = vmatpush.bf16.msra.mxu1 %v1625_v33  ;;  %600 = vmatpush.bf16.msra.mxu2 %v1565_v34  ;;  %v2039_v51 = vld [vmem:[%s2862_s1 + $0xb4] sm:$0xf0]  ;;  %v1546_v53 = vld [vmem:[%s2862_s1 + $0x38] sm:$0xf0]  ;;  %v2038_v54 = vld [vmem:[%s2862_s1 + $0xb4] sm:$0xf]  ;;  %v1545_v56 = vor.u32 %v2023_v48, %v1544_v47 }
  0x18   : > { %614 = vmatpush.bf16.msra.mxu3 %v1629_v38  ;;  %v1610_v55 = vld [vmem:[%s2862_s1 + $0xb8] sm:$0xf0]  ;;  %v1609_v57 = vor.u32 %v2039_v51, %v1608_v49  ;;  %v1549_v58 = vor.u32 %v2022_v52, %v1546_v53  ;;  %v1536_v59 = vld [vmem:[%s2862_s1 + $0x20] sm:$0xf]  ;;  %v2021_v60 = vld [vmem:[%s2862_s1 + $0x24] sm:$0xf0] }
  0x19   : > { %v1600_v61 = vld [vmem:[%s2862_s1 + $0xa0] sm:$0xf]  ;;  %v1613_v62 = vor.u32 %v2038_v54, %v1610_v55  ;;  %v2037_v63 = vld [vmem:[%s2862_s1 + $0xa4] sm:$0xf0]  ;;  %v2020_v0 = vld [vmem:[%s2862_s1 + $0x24] sm:$0xf]  ;;  %v1537_v4 = vor.u32 %v2021_v60, %v1536_v59 }
  0x1a   : > { %573 = vmatpush.bf16.msra.mxu0 %v1553_v44  ;;  %v1538_v1 = vld [vmem:[%s2862_s1 + $0x28] sm:$0xf0]  ;;  %v2036_v2 = vld [vmem:[%s2862_s1 + $0xa4] sm:$0xf]  ;;  %v1528_v5 = vld [vmem:[%s2862_s1 + $0x10] sm:$0xf]  ;;  %v1601_v6 = vor.u32 %v2037_v63, %v1600_v61 }
  0x1b   : > { %587 = vmatpush.bf16.msra.mxu1 %v1617_v45  ;;  %601 = vmatpush.bf16.msra.mxu2 %v1557_v46  ;;  %v1602_v3 = vld [vmem:[%s2862_s1 + $0xa8] sm:$0xf0]  ;;  %v1541_v7 = vor.u32 %v2020_v0, %v1538_v1  ;;  %v2019_v8 = vld [vmem:[%s2862_s1 + $0x14] sm:$0xf0]  ;;  %v1592_v9 = vld [vmem:[%s2862_s1 + $0x90] sm:$0xf] }
  0x1c   : > { %615 = vmatpush.bf16.msra.mxu3 %v1621_v50  ;;  %v2035_v10 = vld [vmem:[%s2862_s1 + $0x94] sm:$0xf0]  ;;  %v1605_v11 = vor.u32 %v2036_v2, %v1602_v3  ;;  %v2018_v12 = vld [vmem:[%s2862_s1 + $0x14] sm:$0xf]  ;;  %v1530_v13 = vld [vmem:[%s2862_s1 + $0x18] sm:$0xf0]  ;;  %v1529_v17 = vor.u32 %v2019_v8, %v1528_v5 }
  0x1d   : > { %v2034_v14 = vld [vmem:[%s2862_s1 + $0x94] sm:$0xf]  ;;  %v1594_v15 = vld [vmem:[%s2862_s1 + $0x98] sm:$0xf0]  ;;  %v1520_v16 = vld [vmem:[%s2862_s1] sm:$0xf]  ;;  %v1593_v20 = vor.u32 %v2035_v10, %v1592_v9  ;;  %v1533_v21 = vor.u32 %v2018_v12, %v1530_v13 }
  0x1e   : > { %574 = vmatpush.bf16.msra.mxu0 %v1545_v56  ;;  %v2017_v18 = vld [vmem:[%s2862_s1 + $0x4] sm:$0xf0]  ;;  %v1584_v19 = vld [vmem:[%s2862_s1 + $0x80] sm:$0xf]  ;;  %s2384_s7 = scalar_select %p320_p3, %s2201_s22, 5  ;;  %v1597_v25 = vor.u32 %v2034_v14, %v1594_v15  ;;  %vm1376_vm0 = vcmask 1043456  }
  0x1f   : > { %588 = vmatpush.bf16.msra.mxu1 %v1609_v57  ;;  %602 = vmatpush.bf16.msra.mxu2 %v1549_v58  ;;  %v2033_v22 = vld [vmem:[%s2862_s1 + $0x84] sm:$0xf0]  ;;  %v2016_v23 = vld [vmem:[%s2862_s1 + $0x4] sm:$0xf]  ;;  %v1522_v24 = vld [vmem:[%s2862_s1 + $0x8] sm:$0xf0]  ;;  %v1521_v31 = vor.u32 %v2017_v18, %v1520_v16 }
  0x20   : > { %616 = vmatpush.bf16.msra.mxu3 %v1613_v62  ;;  %v2032_v26 = vld [vmem:[%s2862_s1 + $0x84] sm:$0xf]  ;;  %v1586_v27 = vld [vmem:[%s2862_s1 + $0x88] sm:$0xf0]  ;;  %s2013_s18 = sshll.u32 %s2384_s7, 4  ;;  %v1585_v35 = vor.u32 %v2033_v22, %v1584_v19  ;;  %v1525_v36 = vor.u32 %v2016_v23, %v1522_v24  ;;  %s330_s15 = ssub.s32 0, %s2656_s25 }
  0x21   : > { %s324_s23 = scalar_lea.vmem %s2861_s0, %s2013_s18  ;;  %v1760_v28 = vld [vmem:[%s2864_s3 + $0xe0] sm:$0xf]  ;;  %v2078_v29 = vld [vmem:[%s2864_s3 + $0xec] sm:$0xf0]  ;;  %v2076_v30 = vld [vmem:[%s2864_s3 + $0xe4] sm:$0xf]  ;;  %v1589_v39 = vor.u32 %v2032_v26, %v1586_v27  ;;  %s2869_s15 = smov (!%p325_p4, %s330_s15), %s2656_s25 }
  0x22   : > { %575 = vmatpush.bf16.msra.mxu0 %v1537_v4  ;;  %v1512_v32 = vld [vmem:[%s324_s23] sm:$0xf]  ;;  %v2015_v33 = vld [vmem:[%s324_s23 + $0x4] sm:$0xf0]  ;;  %v1762_v34 = vld [vmem:[%s2864_s3 + $0xf0] sm:$0xf0]  ;;  %v1761_v40 = vor.u32 %v2078_v29, %v1760_v28 }
  0x23   : > { %589 = vmatpush.bf16.msra.mxu1 %v1601_v6  ;;  %603 = vmatpush.bf16.msra.mxu2 %v1541_v7  ;;  %v2014_v37 = vld [vmem:[%s324_s23 + $0x4] sm:$0xf]  ;;  %v1514_v38 = vld [vmem:[%s324_s23 + $0x8] sm:$0xf0]  ;;  %v1744_v41 = vld [vmem:[%s2864_s3 + $0xc0] sm:$0xf]  ;;  %v1513_v44 = vor.u32 %v2015_v33, %v1512_v32  ;;  %v1765_v45 = vor.u32 %v2076_v30, %v1762_v34 }
  0x24   : > { %617 = vmatpush.bf16.msra.mxu3 %v1605_v11  ;;  %v1888_v42 = vld [vmem:[%s2864_s3 + $0x1e0] sm:$0xf]  ;;  %v2110_v43 = vld [vmem:[%s2864_s3 + $0x1ec] sm:$0xf0]  ;;  %v2108_v47 = vld [vmem:[%s2864_s3 + $0x1e4] sm:$0xf]  ;;  %v1517_v49 = vor.u32 %v2014_v37, %v1514_v38 }
  0x25   : > { %v2074_v46 = vld [vmem:[%s2864_s3 + $0xcc] sm:$0xf0]  ;;  %v1890_v48 = vld [vmem:[%s2864_s3 + $0x1f0] sm:$0xf0]  ;;  %v2072_v50 = vld [vmem:[%s2864_s3 + $0xc4] sm:$0xf]  ;;  %v1889_v52 = vor.u32 %v2110_v43, %v1888_v42 }
  0x26   : > { %576 = vmatpush.bf16.msra.mxu0 %v1529_v17  ;;  %v1746_v51 = vld [vmem:[%s2864_s3 + $0xd0] sm:$0xf0]  ;;  %v1745_v53 = vor.u32 %v2074_v46, %v1744_v41  ;;  %v1893_v54 = vor.u32 %v2108_v47, %v1890_v48  ;;  %v1728_v55 = vld [vmem:[%s2864_s3 + $0xa0] sm:$0xf]  ;;  %v2106_v57 = vld [vmem:[%s2864_s3 + $0x1cc] sm:$0xf0] }
  0x27   : > { %590 = vmatpush.bf16.msra.mxu1 %v1593_v20  ;;  %604 = vmatpush.bf16.msra.mxu2 %v1533_v21  ;;  %v1872_v56 = vld [vmem:[%s2864_s3 + $0x1c0] sm:$0xf]  ;;  %v1749_v58 = vor.u32 %v2072_v50, %v1746_v51  ;;  %v2070_v59 = vld [vmem:[%s2864_s3 + $0xac] sm:$0xf0]  ;;  %v2104_v60 = vld [vmem:[%s2864_s3 + $0x1c4] sm:$0xf] }
  0x28   : > { %618 = vmatpush.bf16.msra.mxu3 %v1597_v25  ;;  %v1874_v61 = vld [vmem:[%s2864_s3 + $0x1d0] sm:$0xf0]  ;;  %v2068_v62 = vld [vmem:[%s2864_s3 + $0xa4] sm:$0xf]  ;;  %v1873_v0 = vor.u32 %v2106_v57, %v1872_v56  ;;  %v1729_v1 = vor.u32 %v2070_v59, %v1728_v55  ;;  %v1712_v4 = vld [vmem:[%s2864_s3 + $0x80] sm:$0xf] }
  0x29   : > { %v1730_v63 = vld [vmem:[%s2864_s3 + $0xb0] sm:$0xf0]  ;;  %v1877_v2 = vor.u32 %v2104_v60, %v1874_v61  ;;  %v2066_v5 = vld [vmem:[%s2864_s3 + $0x8c] sm:$0xf0]  ;;  %v2064_v6 = vld [vmem:[%s2864_s3 + $0x84] sm:$0xf] }
  0x2a   : > { %577 = vmatpush.bf16.msra.mxu0 %v1521_v31  ;;  %v1733_v3 = vor.u32 %v2068_v62, %v1730_v63  ;;  %v1714_v7 = vld [vmem:[%s2864_s3 + $0x90] sm:$0xf0]  ;;  %v1713_v8 = vor.u32 %v2066_v5, %v1712_v4  ;;  %v1856_v10 = vld [vmem:[%s2864_s3 + $0x1a0] sm:$0xf]  ;;  %v2102_v11 = vld [vmem:[%s2864_s3 + $0x1ac] sm:$0xf0] }
  0x2b   : > { %591 = vmatpush.bf16.msra.mxu1 %v1585_v35  ;;  %605 = vmatpush.bf16.msra.mxu2 %v1525_v36  ;;  %v1717_v9 = vor.u32 %v2064_v6, %v1714_v7  ;;  %v2100_v12 = vld [vmem:[%s2864_s3 + $0x1a4] sm:$0xf]  ;;  %v1857_v13 = vor.u32 %v2102_v11, %v1856_v10  ;;  %v1858_v14 = vld [vmem:[%s2864_s3 + $0x1b0] sm:$0xf0]  ;;  %v1696_v16 = vld [vmem:[%s2864_s3 + $0x60] sm:$0xf] }
  0x2c   : > { %619 = vmatpush.bf16.msra.mxu3 %v1589_v39  ;;  %v1861_v15 = vor.u32 %v2100_v12, %v1858_v14  ;;  %v2062_v17 = vld [vmem:[%s2864_s3 + $0x6c] sm:$0xf0]  ;;  %v2060_v18 = vld [vmem:[%s2864_s3 + $0x64] sm:$0xf]  ;;  %v1698_v20 = vld [vmem:[%s2864_s3 + $0x70] sm:$0xf0] }
  0x2d   : > { %578 = vmatmul.bf16.vlgmr.msra.gmra.mxu0 %v1513_v44  ;;  %v1697_v19 = vor.u32 %v2062_v17, %v1696_v16  ;;  %v1701_v21 = vor.u32 %v2060_v18, %v1698_v20  ;;  %v1840_v22 = vld [vmem:[%s2864_s3 + $0x180] sm:$0xf]  ;;  %v2098_v23 = vld [vmem:[%s2864_s3 + $0x18c] sm:$0xf0]  ;;  %v2096_v24 = vld [vmem:[%s2864_s3 + $0x184] sm:$0xf] }
  0x2e   : > { %1040 = vmatpush.bf16.msrb.mxu0 %v1761_v40  ;;  %592 = vmatmul.bf16.vlgmr.msra.gmra.mxu1 %v1517_v49  ;;  %v1841_v25 = vor.u32 %v2098_v23, %v1840_v22  ;;  %v1842_v26 = vld [vmem:[%s2864_s3 + $0x190] sm:$0xf0]  ;;  %v1680_v28 = vld [vmem:[%s2864_s3 + $0x40] sm:$0xf]  ;;  %v2058_v29 = vld [vmem:[%s2864_s3 + $0x4c] sm:$0xf0] }
  0x2f   : > { %1066 = vmatpush.bf16.msrb.mxu2 %v1765_v45  ;;  %620 = vmatmul.bf16.vlgmr.msra.gmra.mxu3 %v1517_v49  ;;  %v1845_v27 = vor.u32 %v2096_v24, %v1842_v26  ;;  %v2056_v30 = vld [vmem:[%s2864_s3 + $0x44] sm:$0xf]  ;;  %v1681_v31 = vor.u32 %v2058_v29, %v1680_v28  ;;  %v1682_v32 = vld [vmem:[%s2864_s3 + $0x50] sm:$0xf0]  ;;  %v1824_v34 = vld [vmem:[%s2864_s3 + $0x160] sm:$0xf] }
  0x30   : > { %606 = vmatmul.bf16.vlgmr.msra.gmra.mxu2 %v1513_v44  ;;  %1053 = vmatpush.bf16.msrb.mxu1 %v1889_v52  ;;  %v1685_v33 = vor.u32 %v2056_v30, %v1682_v32  ;;  %v2094_v35 = vld [vmem:[%s2864_s3 + $0x16c] sm:$0xf0]  ;;  %v2092_v36 = vld [vmem:[%s2864_s3 + $0x164] sm:$0xf]  ;;  %v1826_v38 = vld [vmem:[%s2864_s3 + $0x170] sm:$0xf0] }
  0x31   : > { %1079 = vmatpush.bf16.msrb.mxu3 %v1893_v54  ;;  %v1825_v37 = vor.u32 %v2094_v35, %v1824_v34  ;;  %v1829_v39 = vor.u32 %v2092_v36, %v1826_v38  ;;  %v1664_v40 = vld [vmem:[%s2864_s3 + $0x20] sm:$0xf]  ;;  %v2054_v41 = vld [vmem:[%s2864_s3 + $0x2c] sm:$0xf0]  ;;  %v2052_v42 = vld [vmem:[%s2864_s3 + $0x24] sm:$0xf] }
  0x32   : > { %1041 = vmatpush.bf16.msrb.mxu0 %v1745_v53  ;;  %v1665_v43 = vor.u32 %v2054_v41, %v1664_v40  ;;  %v1666_v44 = vld [vmem:[%s2864_s3 + $0x30] sm:$0xf0]  ;;  %v1808_v46 = vld [vmem:[%s2864_s3 + $0x140] sm:$0xf]  ;;  %v2090_v47 = vld [vmem:[%s2864_s3 + $0x14c] sm:$0xf0] }
  0x33   : > { %1067 = vmatpush.bf16.msrb.mxu2 %v1749_v58  ;;  %v1669_v45 = vor.u32 %v2052_v42, %v1666_v44  ;;  %v2088_v48 = vld [vmem:[%s2864_s3 + $0x144] sm:$0xf]  ;;  %v1809_v49 = vor.u32 %v2090_v47, %v1808_v46  ;;  %v1810_v50 = vld [vmem:[%s2864_s3 + $0x150] sm:$0xf0]  ;;  %v1648_v52 = vld [vmem:[%s2864_s3] sm:$0xf] }
  0x34   : > { %1054 = vmatpush.bf16.msrb.mxu1 %v1873_v0  ;;  %v1813_v51 = vor.u32 %v2088_v48, %v1810_v50  ;;  %v2050_v53 = vld [vmem:[%s2864_s3 + $0xc] sm:$0xf0]  ;;  %v2048_v54 = vld [vmem:[%s2864_s3 + $0x4] sm:$0xf]  ;;  %v1650_v56 = vld [vmem:[%s2864_s3 + $0x10] sm:$0xf0] }
  0x35   : > { %1080 = vmatpush.bf16.msrb.mxu3 %v1877_v2  ;;  %v1649_v55 = vor.u32 %v2050_v53, %v1648_v52  ;;  %v1768_v57 = vld [vmem:[%s2864_s3 + $0xe8] sm:$0xf]  ;;  %v2079_v58 = vld [vmem:[%s2864_s3 + $0xf4] sm:$0xf0]  ;;  %v1653_v59 = vor.u32 %v2048_v54, %v1650_v56  ;;  %v2077_v61 = vld [vmem:[%s2864_s3 + $0xec] sm:$0xf] }
  0x36   : > { %1042 = vmatpush.bf16.msrb.mxu0 %v1729_v1  ;;  %v1769_v60 = vor.u32 %v2079_v58, %v1768_v57  ;;  %v1770_v62 = vld [vmem:[%s2864_s3 + $0xf8] sm:$0xf0]  ;;  %v1792_v63 = vld [vmem:[%s2864_s3 + $0x120] sm:$0xf]  ;;  %v2086_v1 = vld [vmem:[%s2864_s3 + $0x12c] sm:$0xf0] }
  0x37   : > { %1068 = vmatpush.bf16.msrb.mxu2 %v1733_v3  ;;  %v1773_v0 = vor.u32 %v2077_v61, %v1770_v62  ;;  %v2084_v2 = vld [vmem:[%s2864_s3 + $0x124] sm:$0xf]  ;;  %v1794_v3 = vld [vmem:[%s2864_s3 + $0x130] sm:$0xf0]  ;;  %v1793_v4 = vor.u32 %v2086_v1, %v1792_v63  ;;  %v1752_v6 = vld [vmem:[%s2864_s3 + $0xc8] sm:$0xf] }
  0x38   : > { %1055 = vmatpush.bf16.msrb.mxu1 %v1857_v13  ;;  %v1797_v5 = vor.u32 %v2084_v2, %v1794_v3  ;;  %v2075_v7 = vld [vmem:[%s2864_s3 + $0xd4] sm:$0xf0]  ;;  %v1754_v10 = vld [vmem:[%s2864_s3 + $0xd8] sm:$0xf0]  ;;  %v1776_v11 = vld [vmem:[%s2864_s3 + $0x100] sm:$0xf] }
  0x39   : > { %1081 = vmatpush.bf16.msrb.mxu3 %v1861_v15  ;;  %v2082_v12 = vld [vmem:[%s2864_s3 + $0x10c] sm:$0xf0]  ;;  %v2080_v15 = vld [vmem:[%s2864_s3 + $0x104] sm:$0xf]  ;;  %v1778_v16 = vld [vmem:[%s2864_s3 + $0x110] sm:$0xf0] }
  0x3a   : > { %1043 = vmatpush.bf16.msrb.mxu0 %v1713_v8  ;;  %v2073_v8 = vld [vmem:[%s2864_s3 + $0xcc] sm:$0xf]  ;;  %v1777_v14 = vor.u32 %v2082_v12, %v1776_v11  ;;  %v1896_v17 = vld [vmem:[%s2864_s3 + $0x1e8] sm:$0xf]  ;;  %v1781_v18 = vor.u32 %v2080_v15, %v1778_v16  ;;  %v1738_v28 = vld [vmem:[%s2864_s3 + $0xb8] sm:$0xf0] }
  0x3b   : > { %1069 = vmatpush.bf16.msrb.mxu2 %v1717_v9  ;;  %v1753_v9 = vor.u32 %v2075_v7, %v1752_v6  ;;  %v1757_v13 = vor.u32 %v2073_v8, %v1754_v10  ;;  %v2109_v20 = vld [vmem:[%s2864_s3 + $0x1ec] sm:$0xf]  ;;  %v1736_v24 = vld [vmem:[%s2864_s3 + $0xa8] sm:$0xf]  ;;  %v1882_v35 = vld [vmem:[%s2864_s3 + $0x1d8] sm:$0xf0] }
  0x3c   : > { %1056 = vmatpush.bf16.msrb.mxu1 %v1841_v25  ;;  %v2071_v25 = vld [vmem:[%s2864_s3 + $0xb4] sm:$0xf0]  ;;  %v2069_v26 = vld [vmem:[%s2864_s3 + $0xac] sm:$0xf]  ;;  %v1880_v30 = vld [vmem:[%s2864_s3 + $0x1c8] sm:$0xf] }
  0x3d   : > { %1082 = vmatpush.bf16.msrb.mxu3 %v1845_v27  ;;  %v1737_v27 = vor.u32 %v2071_v25, %v1736_v24  ;;  %v1741_v29 = vor.u32 %v2069_v26, %v1738_v28  ;;  %v2105_v32 = vld [vmem:[%s2864_s3 + $0x1cc] sm:$0xf]  ;;  %v2067_v38 = vld [vmem:[%s2864_s3 + $0x94] sm:$0xf0]  ;;  %v1722_v41 = vld [vmem:[%s2864_s3 + $0x98] sm:$0xf0] }
  0x3e   : > { %1044 = vmatpush.bf16.msrb.mxu0 %v1697_v19  ;;  %v2111_v19 = vld [vmem:[%s2864_s3 + $0x1f4] sm:$0xf0]  ;;  %v1885_v36 = vor.u32 %v2105_v32, %v1882_v35  ;;  %v1866_v48 = vld [vmem:[%s2864_s3 + $0x1b8] sm:$0xf0]  ;;  %v1704_v50 = vld [vmem:[%s2864_s3 + $0x68] sm:$0xf] }
  0x3f   : > { %1070 = vmatpush.bf16.msrb.mxu2 %v1701_v21  ;;  %v1898_v21 = vld [vmem:[%s2864_s3 + $0x1f8] sm:$0xf0]  ;;  %v1897_v22 = vor.u32 %v2111_v19, %v1896_v17  ;;  %v2103_v44 = vld [vmem:[%s2864_s3 + $0x1b4] sm:$0xf0]  ;;  %v2061_v52 = vld [vmem:[%s2864_s3 + $0x6c] sm:$0xf] }
  0x40   : > { %1057 = vmatpush.bf16.msrb.mxu1 %v1825_v37  ;;  %v1901_v23 = vor.u32 %v2109_v20, %v1898_v21  ;;  %v1720_v37 = vld [vmem:[%s2864_s3 + $0x88] sm:$0xf]  ;;  %v2099_v57 = vld [vmem:[%s2864_s3 + $0x194] sm:$0xf0]  ;;  %v2097_v61 = vld [vmem:[%s2864_s3 + $0x18c] sm:$0xf] }
  0x41   : > { %1083 = vmatpush.bf16.msrb.mxu3 %v1829_v39  ;;  %v2065_v39 = vld [vmem:[%s2864_s3 + $0x8c] sm:$0xf]  ;;  %v1721_v40 = vor.u32 %v2067_v38, %v1720_v37  ;;  %v1848_v56 = vld [vmem:[%s2864_s3 + $0x188] sm:$0xf]  ;;  %v1850_v62 = vld [vmem:[%s2864_s3 + $0x198] sm:$0xf0] }
  0x42   : > { %1045 = vmatpush.bf16.msrb.mxu0 %v1681_v31  ;;  %v2107_v31 = vld [vmem:[%s2864_s3 + $0x1d4] sm:$0xf0]  ;;  %v1725_v42 = vor.u32 %v2065_v39, %v1722_v41  ;;  %v1688_v63 = vld [vmem:[%s2864_s3 + $0x48] sm:$0xf]  ;;  %v2057_v2 = vld [vmem:[%s2864_s3 + $0x4c] sm:$0xf] }
  0x43   : > { %1071 = vmatpush.bf16.msrb.mxu2 %v1685_v33  ;;  %v2661_v33 = vld [vmem:[%s2863_s2] sm:$0x3]  ;;  %v1881_v34 = vor.u32 %v2107_v31, %v1880_v30  ;;  %v2059_v1 = vld [vmem:[%s2864_s3 + $0x54] sm:$0xf0]  ;;  %v1690_v3 = vld [vmem:[%s2864_s3 + $0x58] sm:$0xf0] }
  0x44   : > { %1058 = vmatpush.bf16.msrb.mxu1 %v1809_v49  ;;  %v396_v46 = vperm.slane %v2661_v33, 0  ;;  %p1508_p5 = scmp.lt.s32.totalorder %s2869_s15, 0  ;;  %v397_v7 = vperm.slane %v2661_v33, 1  ;;  %v1832_v8 = vld [vmem:[%s2864_s3 + $0x168] sm:$0xf]  ;;  %s336_s11 = sadd.s32 3, %s2869_s15 }
  0x45   : > { %1084 = vmatpush.bf16.msrb.mxu3 %v1813_v51  ;;  %v2063_v51 = vld [vmem:[%s2864_s3 + $0x74] sm:$0xf0]  ;;  %v2093_v11 = vld [vmem:[%s2864_s3 + $0x16c] sm:$0xf]  ;;  %v1834_v12 = vld [vmem:[%s2864_s3 + $0x178] sm:$0xf0] }
  0x46   : > { %1046 = vmatpush.bf16.msrb.mxu0 %v1665_v43  ;;  %v1864_v43 = vld [vmem:[%s2864_s3 + $0x1a8] sm:$0xf]  ;;  %v1705_v54 = vor.u32 %v2063_v51, %v1704_v50  ;;  %v1837_v15 = vor.u32 %v2093_v11, %v1834_v12  ;;  %v2055_v16 = vld [vmem:[%s2864_s3 + $0x34] sm:$0xf0]  ;;  %v2053_v17 = vld [vmem:[%s2864_s3 + $0x2c] sm:$0xf]  ;;  %s2871_s11 = smov (!%p1508_p5, %s336_s11), %s2869_s15  ;;  %s358_s15 = scalar_lea.vmem %s2867_s6, %s2384_s7 }
  0x47   : > { %1072 = vmatpush.bf16.msrb.mxu2 %v1669_v45  ;;  %v2101_v45 = vld [vmem:[%s2864_s3 + $0x1ac] sm:$0xf]  ;;  %v1865_v47 = vor.u32 %v2103_v44, %v1864_v43  ;;  %v2091_v24 = vld [vmem:[%s2864_s3 + $0x154] sm:$0xf0]  ;;  %v1656_v30 = vld [vmem:[%s2864_s3 + $0x8] sm:$0xf] }
  0x48   : > { %1059 = vmatpush.bf16.msrb.mxu1 %v1793_v4  ;;  %v1869_v49 = vor.u32 %v2101_v45, %v1866_v48  ;;  %v1689_v4 = vor.u32 %v2059_v1, %v1688_v63  ;;  %v2089_v25 = vld [vmem:[%s2864_s3 + $0x14c] sm:$0xf]  ;;  %v2051_v31 = vld [vmem:[%s2864_s3 + $0x14] sm:$0xf0]  ;;  %v1800_v37 = vld [vmem:[%s2864_s3 + $0x128] sm:$0xf] }
  0x49   : > { %1085 = vmatpush.bf16.msrb.mxu3 %v1797_v5  ;;  %v1693_v5 = vor.u32 %v2057_v2, %v1690_v3  ;;  %v2049_v35 = vld [vmem:[%s2864_s3 + $0xc] sm:$0xf]  ;;  %p338_p6 = scmp.lt.s32.totalorder %s2871_s11, 2  ;;  %v1784_v50 = vld [vmem:[%s2864_s3 + $0x108] sm:$0xf]  ;;  %vm1372_vm1 = vcmask 457728  }
  0x4a   : > { %1047 = vmatpush.bf16.msrb.mxu0 %v1649_v55  ;;  %v1706_v55 = vld [vmem:[%s2864_s3 + $0x78] sm:$0xf0]  ;;  %v2085_v41 = vld [vmem:[%s2864_s3 + $0x12c] sm:$0xf]  ;;  %v2083_v51 = vld [vmem:[%s2864_s3 + $0x114] sm:$0xf0] }
  0x4b   : > { %1073 = vmatpush.bf16.msrb.mxu2 %v1653_v59  ;;  %v1709_v59 = vor.u32 %v2061_v52, %v1706_v55  ;;  %v2081_v52 = vld [vmem:[%s2864_s3 + $0x10c] sm:$0xf]  ;;  %v1786_v55 = vld [vmem:[%s2864_s3 + $0x118] sm:$0xf0]  ;;  %s2873_s11 = smov (!%p338_p6, %s2871_s11), 2  ;;  %vm1432_vm2 = vcmask 24576  }
  0x4c   : > { %1060 = vmatpush.bf16.msrb.mxu1 %v1777_v14  ;;  %s2139_s16 = smul.u32 220, %s2873_s11 }
  0x4d   : > { %1086 = vmatpush.bf16.msrb.mxu3 %v1781_v18  ;;  %v1674_v18 = vld [vmem:[%s2864_s3 + $0x38] sm:$0xf0] }
  0x4e   : > { %1092 = vmatpush.bf16.msra.mxu0 %v1769_v60  ;;  %v1849_v60 = vor.u32 %v2099_v57, %v1848_v56  ;;  %s2821_s19 = scalar_lea.vmem %s2866_s5, %s2139_s16 }
  0x4f   : > { %1118 = vmatpush.bf16.msra.mxu2 %v1773_v0  ;;  %v1853_v0 = vor.u32 %v2097_v61, %v1850_v62 }
  0x50   : > { %1105 = vmatpush.bf16.msra.mxu1 %v1897_v22  ;;  %v1677_v22 = vor.u32 %v2053_v17, %v1674_v18  ;;  %v2117_v17 = vld [vmem:[%s2821_s19 + $0x28] sm:$0xff]  ;;  %v2126_v18 = vld [vmem:[%s2821_s19 + $0x70] sm:$0xff] }
  0x51   : > { %1131 = vmatpush.bf16.msra.mxu3 %v1901_v23  ;;  %v1816_v23 = vld [vmem:[%s2864_s3 + $0x148] sm:$0xf] }
  0x52   : > { %1093 = vmatpush.bf16.msra.mxu0 %v1753_v9  ;;  %v2095_v9 = vld [vmem:[%s2864_s3 + $0x174] sm:$0xf0]  ;;  %v1817_v28 = vor.u32 %v2091_v24, %v1816_v23  ;;  %v2133_v23 = vld [vmem:[%s2821_s19 + $0xa8] sm:$0xff]  ;;  %v2124_v24 = vld [vmem:[%s2821_s19 + $0x60] sm:$0xff] }
  0x53   : > { %1119 = vmatpush.bf16.msra.mxu2 %v1757_v13  ;;  %v1833_v10 = vor.u32 %v2095_v9, %v1832_v8  ;;  %v1672_v13 = vld [vmem:[%s2864_s3 + $0x28] sm:$0xf]  ;;  %v2119_v8 = vld [vmem:[%s2821_s19 + $0x38] sm:$0xff] }
  0x54   : > { %1106 = vmatpush.bf16.msra.mxu1 %v1881_v34  ;;  %v1673_v21 = vor.u32 %v2055_v16, %v1672_v13  ;;  %v1657_v34 = vor.u32 %v2051_v31, %v1656_v30  ;;  %v2135_v9 = vld [vmem:[%s2821_s19 + $0xb8] sm:$0xff]  ;;  %v2118_v13 = vld [vmem:[%s2821_s19 + $0x30] sm:$0xff] }
  0x55   : > { %1132 = vmatpush.bf16.msra.mxu3 %v1885_v36  ;;  %v1658_v36 = vld [vmem:[%s2864_s3 + $0x18] sm:$0xf0] }
  0x56   : > { %1094 = vmatpush.bf16.msra.mxu0 %v1737_v27  ;;  %v1661_v39 = vor.u32 %v2049_v35, %v1658_v36  ;;  %v2131_v30 = vld [vmem:[%s2821_s19 + $0x98] sm:$0xff]  ;;  %v2138_v35 = vld [vmem:[%s2821_s19 + $0xd0] sm:$0xff]  ;;  %v2113_v36 = vld [vmem:[%s2821_s19 + $0x8] sm:$0xff] }
  0x57   : > { %1120 = vmatpush.bf16.msra.mxu2 %v1741_v29  ;;  %v1818_v29 = vld [vmem:[%s2864_s3 + $0x158] sm:$0xf0] }
  0x58   : > { %1107 = vmatpush.bf16.msra.mxu1 %v1865_v47  ;;  %v1821_v33 = vor.u32 %v2089_v25, %v1818_v29  ;;  %v2132_v25 = vld [vmem:[%s2821_s19 + $0xa0] sm:$0xff]  ;;  %v2123_v29 = vld [vmem:[%s2821_s19 + $0x58] sm:$0xff] }
  0x59   : > { %1133 = vmatpush.bf16.msra.mxu3 %v1869_v49 }
  0x5a   : > { %1095 = vmatpush.bf16.msra.mxu0 %v1721_v40  ;;  %v2087_v40 = vld [vmem:[%s2864_s3 + $0x134] sm:$0xf0] }
  0x5b   : > { %1121 = vmatpush.bf16.msra.mxu2 %v1725_v42  ;;  %v1802_v42 = vld [vmem:[%s2864_s3 + $0x138] sm:$0xf0] }
  0x5c   : > { %1108 = vmatpush.bf16.msra.mxu1 %v1849_v60  ;;  %v1805_v47 = vor.u32 %v2085_v41, %v1802_v42  ;;  %v2120_v41 = vld [vmem:[%s2821_s19 + $0x40] sm:$0xff] }
  0x5d   : > { %1134 = vmatpush.bf16.msra.mxu3 %v1853_v0  ;;  %v2128_v42 = vld [vmem:[%s2821_s19 + $0x80] sm:$0xff] }
  0x5e   : > { %1096 = vmatpush.bf16.msra.mxu0 %v1705_v54 }
  0x5f   : > { %1122 = vmatpush.bf16.msra.mxu2 %v1709_v59  ;;  %v1789_v59 = vor.u32 %v2081_v52, %v1786_v55 }
  0x60   : > { %1109 = vmatpush.bf16.msra.mxu1 %v1833_v10 }
  0x61   : > { %1135 = vmatpush.bf16.msra.mxu3 %v1837_v15  ;;  %v2127_v15 = vld [vmem:[%s2821_s19 + $0x78] sm:$0xff] }
  0x62   : > { %1097 = vmatpush.bf16.msra.mxu0 %v1689_v4 }
  0x63   : > { %1123 = vmatpush.bf16.msra.mxu2 %v1693_v5 }
  0x64   : > { %1110 = vmatpush.bf16.msra.mxu1 %v1817_v28 }
  0x65   : > { %1136 = vmatpush.bf16.msra.mxu3 %v1821_v33  ;;  %v2122_v33 = vld [vmem:[%s2821_s19 + $0x50] sm:$0xff] }
  0x66   : > { %1098 = vmatpush.bf16.msra.mxu0 %v1673_v21  ;;  %v2115_v21 = vld [vmem:[%s2821_s19 + $0x18] sm:$0xff] }
  0x67   : > { %1124 = vmatpush.bf16.msra.mxu2 %v1677_v22  ;;  %v2134_v22 = vld [vmem:[%s2821_s19 + $0xb0] sm:$0xff] }
  0x69   : > { %1137 = vmatpush.bf16.msra.mxu3 %v1805_v47 }
  0x6a   : > { %1099 = vmatpush.bf16.msra.mxu0 %v1657_v34  ;;  %v2130_v34 = vld [vmem:[%s2821_s19 + $0x90] sm:$0xff] }
  0x6b   : > { %1125 = vmatpush.bf16.msra.mxu2 %v1661_v39  ;;  %v2137_v39 = vld [vmem:[%s2821_s19 + $0xc8] sm:$0xff] }
  0x6d   : > { %1138 = vmatpush.bf16.msra.mxu3 %v1789_v59 }
  0xaa   : > { %v579_v53 = vpop.f32.mrf.mxu0 }
  0xab   : > { %v593_v58 = vpop.f32.mrf.mxu1  ;;  %v580_v6 = vadd.f32 %v579_v53, %v396_v46 }
  0xad   : > { %v594_v26 = vadd.f32 %v593_v58, %v580_v6  ;;  %v1785_v58 = vor.u32 %v2083_v51, %v1784_v50 }
  0xaf   : > { %v626_v44 = vmax.f32 %v594_v26, 0.0  ;;  %v1206_v26 = vld [vmem:[%s2821_s19 + $0xd8] sm:$0xf] }
  0xb2   : > { %v621_v19 = vpop.f32.mrf.mxu3  ;;  %v581_v20 = vpop.f32.mrf.mxu0 }
  0xb3   : > { %v607_v14 = vpop.f32.mrf.mxu2  ;;  %v582_v27 = vadd.f32 %v581_v20, %v396_v46  ;;  %v595_v32 = vpop.f32.mrf.mxu1  ;;  %v1801_v46 = vor.u32 %v2087_v40, %v1800_v37  ;;  %v2125_v20 = vld [vmem:[%s2821_s19 + $0x68] sm:$0xff]  ;;  %v2112_v40 = vld [vmem:[%s2821_s19] sm:$0xff] }
  0xb4   : > { %v608_v43 = vadd.f32 %v607_v14, %v397_v7  ;;  %v2121_v37 = vld [vmem:[%s2821_s19 + $0x48] sm:$0xff] }
  0xb5   : > { %v596_v38 = vadd.f32 %v595_v32, %v582_v27  ;;  %1111 = vmatpush.bf16.msra.mxu1 %v1801_v46  ;;  %v1316_v27 = vunpack.c.l.b16 %v1206_v26  ;;  %v2114_v32 = vld [vmem:[%s2821_s19 + $0x10] sm:$0xff] }
  0xb6   : > { %v622_v53 = vadd.f32 %v621_v19, %v608_v43  ;;  %v2116_v19 = vld [vmem:[%s2821_s19 + $0x20] sm:$0xff] }
  0xb7   : > { %v628_v45 = vmax.f32 %v596_v38, 0.0  ;;  %v1344_v28 = vpack.c.b16 %v1316_v27, %v1316_v27  ;;  %v2129_v38 = vld [vmem:[%s2821_s19 + $0x88] sm:$0xff]  ;;  %v2136_v43 = vld [vmem:[%s2821_s19 + $0xc0] sm:$0xff] }
  0xb8   : > { %v627_v62 = vmax.f32 %v622_v53, 0.0 }
  0xb9   : > { %v630_v48 = vadd.f32 %v628_v45, %v626_v44  ;;  %1112 = vmatpush.bf16.msra.mxu1 %v1785_v58  ;;  %v1378_v31 = vsel %vm1376_vm0, %v1344_v28, 0  ;;  %v710_v44 = vld [vmem:[%s2865_s4] sm:$0xf] }
  0xba   : > { %v623_v57 = vpop.f32.mrf.mxu3  ;;  %v1032_v46 = vperm.slane %v710_v44, 0  ;;  %v1033_v51 = vperm.slane %v710_v44, 1 }
  0xbb   : > { %v609_v49 = vpop.f32.mrf.mxu2  ;;  %v631_v56 = vrot.slane %v630_v48, 4 }
  0xbc   : > { %v610_v54 = vadd.f32 %v609_v49, %v397_v7 }
  0xbd   : > { %v632_v61 = vadd.f32 %v631_v56, %v630_v48 }
  0xbe   : > { %v624_v60 = vadd.f32 %v623_v57, %v610_v54 }
  0xbf   : > { %v633_v0 = vrot.slane %v632_v61, 2 }
  0xc0   : > { %v629_v63 = vmax.f32 %v624_v60, 0.0 }
  0xc1   : > { %v634_v2 = vadd.f32 %v633_v0, %v632_v61 }
  0xc2   : > { %v637_v1 = vadd.f32 %v629_v63, %v627_v62  ;;  %v1034_v63 = vperm.slane %v710_v44, 2 }
  0xc3   : > { %v635_v4 = vrot.slane %v634_v2, 1 }
  0xc4   : > { %v638_v3 = vrot.slane %v637_v1, 4 }
  0xc5   : > { %v636_v6 = vadd.f32 %v635_v4, %v634_v2 }
  0xc6   : > { %v639_v5 = vadd.f32 %v638_v3, %v637_v1 }
  0xc7   : > { %v644_v10 = vpack.c.bf16 %v636_v6, %v636_v6 }
  0xc8   : > { %v640_v7 = vrot.slane %v639_v5, 2 }
  0xc9   : > { %1048 = vmatmul.bf16.vlgmr.msrb.gmra.mxu0 %v644_v10  ;;  %1074 = vmatmul.bf16.vlgmr.msrb.gmra.mxu2 %v644_v10 }
  0xca   : > { %v641_v11 = vadd.f32 %v640_v7, %v639_v5  ;;  %1380 = vmatpush.bf16.msrb.mxu0 %v2119_v8  ;;  %1406 = vmatpush.bf16.msrb.mxu2 %v2135_v9  ;;  %v1035_v5 = vperm.slane %v710_v44, 3 }
  0xcc   : > { %v642_v12 = vrot.slane %v641_v11, 1 }
  0xce   : > { %v643_v14 = vadd.f32 %v642_v12, %v641_v11  ;;  %1381 = vmatpush.bf16.msrb.mxu0 %v2118_v13  ;;  %1407 = vmatpush.bf16.msrb.mxu2 %v2134_v22 }
  0xd0   : > { %v645_v16 = vpack.c.bf16 %v643_v14, %v643_v14 }
  0xd2   : > { %1061 = vmatmul.bf16.vlgmr.msrb.gmra.mxu1 %v645_v16  ;;  %1087 = vmatmul.bf16.vlgmr.msrb.gmra.mxu3 %v645_v16 }
  0xd3   : > { %1393 = vmatpush.bf16.msrb.mxu1 %v2127_v15  ;;  %1382 = vmatpush.bf16.msrb.mxu0 %v2117_v17 }
  0xd4   : > { %1408 = vmatpush.bf16.msrb.mxu2 %v2133_v23  ;;  %1423 = vmatpush.bf16.msrb.mxu3 %v1378_v31 }
  0xd7   : > { %1394 = vmatpush.bf16.msrb.mxu1 %v2126_v18  ;;  %1383 = vmatpush.bf16.msrb.mxu0 %v2116_v19 }
  0xd8   : > { %1409 = vmatpush.bf16.msrb.mxu2 %v2132_v25  ;;  %1424 = vmatpush.bf16.msrb.mxu3 %v2138_v35 }
  0xd9   : > { %1100 = vmatmul.bf16.vlgmr.msra.gmra.mxu0 %v644_v10  ;;  %1126 = vmatmul.bf16.vlgmr.msra.gmra.mxu2 %v644_v10 }
  0xdb   : > { %1395 = vmatpush.bf16.msrb.mxu1 %v2125_v20  ;;  %1384 = vmatpush.bf16.msrb.mxu0 %v2115_v21 }
  0xdc   : > { %1410 = vmatpush.bf16.msrb.mxu2 %v2131_v30  ;;  %1425 = vmatpush.bf16.msrb.mxu3 %v2137_v39 }
  0xdf   : > { %1396 = vmatpush.bf16.msrb.mxu1 %v2124_v24  ;;  %1385 = vmatpush.bf16.msrb.mxu0 %v2114_v32 }
  0xe0   : > { %1411 = vmatpush.bf16.msrb.mxu2 %v2130_v34  ;;  %1426 = vmatpush.bf16.msrb.mxu3 %v2136_v43 }
  0xe2   : > { %1113 = vmatmul.bf16.vlgmr.msra.gmra.mxu1 %v645_v16  ;;  %1139 = vmatmul.bf16.vlgmr.msra.gmra.mxu3 %v645_v16 }
  0xe3   : > { %1397 = vmatpush.bf16.msrb.mxu1 %v2123_v29  ;;  %1386 = vmatpush.bf16.msrb.mxu0 %v2113_v36 }
  0xe4   : > { %1412 = vmatpush.bf16.msrb.mxu2 %v2129_v38 }
  0xe7   : > { %1398 = vmatpush.bf16.msrb.mxu1 %v2122_v33  ;;  %1387 = vmatpush.bf16.msrb.mxu0 %v2112_v40 }
  0xe8   : > { %1413 = vmatpush.bf16.msrb.mxu2 %v2128_v42 }
  0xeb   : > { %1399 = vmatpush.bf16.msrb.mxu1 %v2121_v37 }
  0xef   : > { %1400 = vmatpush.bf16.msrb.mxu1 %v2120_v41 }
 0x146   : > { %v1049_v45 = vpop.f32.mrf.mxu0 }
 0x147   : > { %v1050_v47 = vadd.f32 %v1049_v45, %v1032_v46 }
 0x14c   : > { %v1075_v48 = vpop.f32.mrf.mxu2 }
 0x14d   : > { %v1076_v55 = vadd.f32 %v1075_v48, %v1033_v51 }
 0x14e   : > { %v1051_v52 = vpop.f32.mrf.mxu0 }
 0x14f   : > { %v1062_v49 = vpop.f32.mrf.mxu1 }
 0x150   : > { %v1063_v50 = vadd.f32 %v1062_v49, %v1050_v47 }
 0x152   : > { %v1144_v53 = vmax.f32 %v1063_v50, 0.0 }
 0x154   : > { %v1148_v54 = vpack.c.bf16 %v1144_v53, %v1144_v53  ;;  %v1077_v58 = vpop.f32.mrf.mxu2 }
 0x155   : > { %v1088_v56 = vpop.f32.mrf.mxu3 }
 0x156   : > { %v1089_v57 = vadd.f32 %v1088_v56, %v1076_v55  ;;  %1388 = vmatmul.bf16.vlgmr.msrb.gmra.mxu0 %v1148_v54  ;;  %v1101_v61 = vpop.f32.mrf.mxu0 }
 0x157   : > { %v1064_v59 = vpop.f32.mrf.mxu1  ;;  %v1102_v1 = vadd.f32 %v1101_v61, %v1034_v63 }
 0x158   : > { %v1145_v60 = vmax.f32 %v1089_v57, 0.0 }
 0x15a   : > { %v1149_v62 = vpack.c.bf16 %v1145_v60, %v1145_v60 }
 0x15c   : > { %1401 = vmatmul.bf16.vlgmr.msrb.gmra.mxu1 %v1149_v62  ;;  %v1127_v2 = vpop.f32.mrf.mxu2 }
 0x15d   : > { %v1090_v0 = vpop.f32.mrf.mxu3  ;;  %v1128_v9 = vadd.f32 %v1127_v2, %v1035_v5 }
 0x15e   : > { %v1103_v6 = vpop.f32.mrf.mxu0 }
 0x15f   : > { %v1114_v3 = vpop.f32.mrf.mxu1 }
 0x160   : > { %v1115_v4 = vadd.f32 %v1114_v3, %v1102_v1 }
 0x162   : > { %v1146_v7 = vmax.f32 %v1115_v4, 0.0 }
 0x164   : > { %v1150_v8 = vpack.c.bf16 %v1146_v7, %v1146_v7  ;;  %v1129_v12 = vpop.f32.mrf.mxu2 }
 0x165   : > { %v1140_v10 = vpop.f32.mrf.mxu3 }
 0x166   : > { %v1141_v11 = vadd.f32 %v1140_v10, %v1128_v9  ;;  %1414 = vmatmul.bf16.vlgmr.msrb.gmra.mxu2 %v1150_v8 }
 0x167   : > { %v1116_v13 = vpop.f32.mrf.mxu1 }
 0x168   : > { %v1147_v14 = vmax.f32 %v1141_v11, 0.0 }
 0x16a   : > { %v1151_v15 = vpack.c.bf16 %v1147_v14, %v1147_v14 }
 0x16c   : > { %2010 = vmatmul.msk.bf16.vlgmr.msrb.gmra.mxu3 %vm1372_vm1, %v1151_v15 }
 0x16d   : > { %v1142_v16 = vpop.f32.mrf.mxu3 }
 0x1d3   : > { %v1389_v17 = vpop.f32.mrf.mxu0 }
 0x1d9   : > { %v1402_v18 = vpop.f32.mrf.mxu1 }
 0x1da   : > { %v1403_v22 = vadd.f32 %v1402_v18, %v1389_v17 }
 0x1db   : > { %v1391_v19 = vpop.f32.mrf.mxu0 }
 0x1e1   : > { %v1404_v20 = vpop.f32.mrf.mxu1 }
 0x1e9   : > { %v1415_v21 = vpop.f32.mrf.mxu2 }
 0x1ea   : > { %v1416_v23 = vadd.f32 %v1415_v21, %v1403_v22 }
 0x1ef   : > { %v1428_v24 = vpop.f32.mrf.mxu3 }
 0x1f0   : > { %v1429_v25 = vadd.f32 %v1428_v24, %v1416_v23 }
 0x1f1   : > { %v1417_v26 = vpop.f32.mrf.mxu2 }
 0x1f2   : > { %1433 = vst.msk [vmem:[%s358_s15] sm:$0x1] %vm1432_vm2, %v1429_v25 }
 0x1f7   : > { %v1430_v27 = vpop.f32.mrf.mxu3 }
 0x1f8 PF: > { %s16_s21 = sadd.s32 1, %s2158_s21  }
 0x1f9   : > { %p13_p7 = scmp.ge.s32.totalorder %s16_s21, 8  }
 0x1fb   :  { %15 = sbr.rel (!%p13_p7) target bundleno = 1 (0x1), region = 77 }

</bundles_post_ra>
